<compile_context>
chip_gen: v5e
topology: v5e:2x2
jax: 0.10.0
libtpu: 0.0.40
codegen_flags: <defaults>
</compile_context>

<pallas_src>
import functools

import jax
import jax.numpy as jnp
from jax.experimental import pallas as pl
from jax.experimental.pallas import tpu as pltpu


def _round_up(x: int, m: int) -> int:
    return ((x + m - 1) // m) * m


def _vmem_limit_bytes() -> int:
    """Per-generation scoped-VMEM limit: v5e/v6e have 128 MiB physical VMEM,
    v7x only 64 MiB -- keep headroom for Mosaic internal scratch."""
    try:
        kind = jax.devices()[0].device_kind.lower()
    except Exception:  # pragma: no cover - defensive fallback
        return 32 << 20
    if "v5" in kind or "v6" in kind:
        return 64 << 20
    return 48 << 20


def _mlp_kernel(x_ref, w1_ref, b1_ref, w2_ref, b2_ref, o_ref, *, compute_dtype):
    # fc1: (TILE_B, in) @ (in, H_pad) -> f32 accumulate on the MXU.
    x = x_ref[...].astype(compute_dtype)
    h = jnp.dot(x, w1_ref[...], preferred_element_type=jnp.float32)
    h = jnp.maximum(h + b1_ref[...], 0.0)            # bias + ReLU in f32 (VPU)
    # fc2: (TILE_B, H_pad) @ (H_pad, A_pad) -> f32 accumulate on the MXU.
    v = jnp.dot(h.astype(compute_dtype), w2_ref[...],
                preferred_element_type=jnp.float32)
    # tanh on the EUP in f32, store in the (possibly bf16) output dtype.
    o_ref[...] = jnp.tanh(v + b2_ref[...]).astype(o_ref.dtype)


def prepare_params(w1, b1, w2, b2, *, compute_dtype=jnp.bfloat16):
    """One-time layout prep: transpose to (in, out), zero-pad out-dims to 128,
    cast weights to the MXU compute dtype. Do this once, reuse every call."""
    hidden, in_size = w1.shape
    nb_action = w2.shape[0]
    h_pad = _round_up(hidden, 128)
    a_pad = _round_up(nb_action, 128)

    w1p = jnp.zeros((in_size, h_pad), compute_dtype)
    w1p = w1p.at[:, :hidden].set(w1.T.astype(compute_dtype))
    b1p = jnp.zeros((1, h_pad), jnp.float32)
    b1p = b1p.at[:, :hidden].set(b1.astype(jnp.float32))

    w2p = jnp.zeros((h_pad, a_pad), compute_dtype)
    w2p = w2p.at[:hidden, :nb_action].set(w2.T.astype(compute_dtype))
    b2p = jnp.zeros((1, a_pad), jnp.float32)
    b2p = b2p.at[:, :nb_action].set(b2.astype(jnp.float32))

    return (w1p, b1p, w2p, b2p, nb_action)


def network_forward(state, params, *, tile_b=512, compute_dtype=jnp.bfloat16,
                    store_dtype=jnp.bfloat16):
    """Forward pass of `Network`.

    state:  (B, input_size) float32 (or already bf16 from an upstream producer)
    params: output of `prepare_params` (pre-transposed / padded / cast weights)
    returns (B, nb_action) float32
    """
    w1p, b1p, w2p, b2p, nb_action = params
    B, in_size = state.shape
    a_pad = w2p.shape[1]

    # Batch tiling: multiple of 8 sublanes, big enough to amortize the
    # ~0.35us per-step overhead but never larger than the (padded) batch.
    b_pad = _round_up(max(B, 8), 8)
    tb = min(_round_up(tile_b, 8), b_pad)
    # v7x megacore: make sure the batch grid has >= 2 steps whenever the batch
    # can be split, so the "parallel" axis actually uses both TensorCores.
    if b_pad // tb < 2 and b_pad >= 16:
        tb = _round_up(pl.cdiv(b_pad, 2), 8)
    b_pad = _round_up(b_pad, tb)
    if b_pad != B:
        state = jnp.pad(state, ((0, b_pad - B), (0, 0)))

    grid = (b_pad // tb,)

    # Resident weights/biases (constant index_map): single-buffered, no
    # duplicate VMEM copy.  State / output stay double-buffered by default.
    resident = pl.Buffered(1)

    out = pl.pallas_call(
        functools.partial(_mlp_kernel, compute_dtype=compute_dtype),
        out_shape=jax.ShapeDtypeStruct((b_pad, a_pad), store_dtype),
        grid=grid,
        in_specs=[
            pl.BlockSpec((tb, in_size), lambda i: (i, 0)),     # state: tiled over batch
            pl.BlockSpec(w1p.shape, lambda i: (0, 0), pipeline_mode=resident),
            pl.BlockSpec(b1p.shape, lambda i: (0, 0), pipeline_mode=resident),
            pl.BlockSpec(w2p.shape, lambda i: (0, 0), pipeline_mode=resident),
            pl.BlockSpec(b2p.shape, lambda i: (0, 0), pipeline_mode=resident),
        ],
        out_specs=pl.BlockSpec((tb, a_pad), lambda i: (i, 0)),  # lane-dense output
        compiler_params=pltpu.CompilerParams(
            dimension_semantics=("parallel",),     # batch grid: megacore-shardable
            vmem_limit_bytes=_vmem_limit_bytes(),  # per-generation VMEM budget
        ),
    )(state, w1p, b1p, w2p, b2p)

    # Strip batch + lane padding; hand back f32 like the PyTorch module.
    return out[:B, :nb_action].astype(jnp.float32)


def init_params(key, input_size, hidden_size, nb_action):
    """Deterministic init mimicking torch.nn.Linear default
    (U[-1/sqrt(fan_in), 1/sqrt(fan_in)]), in PyTorch weight layout."""
    k1, k2, k3, k4 = jax.random.split(key, 4)
    bound1 = 1.0 / (input_size ** 0.5)
    bound2 = 1.0 / (hidden_size ** 0.5)
    w1 = jax.random.uniform(k1, (hidden_size, input_size), jnp.float32, -bound1, bound1)
    b1 = jax.random.uniform(k2, (hidden_size,), jnp.float32, -bound1, bound1)
    w2 = jax.random.uniform(k3, (nb_action, hidden_size), jnp.float32, -bound2, bound2)
    b2 = jax.random.uniform(k4, (nb_action,), jnp.float32, -bound2, bound2)
    return w1, b1, w2, b2


if __name__ == "__main__":
    key = jax.random.PRNGKey(0)
    kx, kp = jax.random.split(key)

    # NOTE: at this demo size the call is pure launch/DMA overhead -- real
    # deployments should batch many states per call (the kernel tiles and
    # megacore-shards batches of hundreds/thousands of rows automatically).
    batch = 8
    input_size = 32
    hidden_size = 32
    nb_action = 8

    state = jax.random.normal(kx, (batch, input_size), jnp.float32)
    w1, b1, w2, b2 = init_params(kp, input_size, hidden_size, nb_action)

    # One-time parameter prep (transpose / pad / bf16 cast), then forward.
    params = prepare_params(w1, b1, w2, b2, compute_dtype=jnp.bfloat16)
    values = network_forward(state, params)
    jax.block_until_ready(values)
    assert values.shape == (batch, nb_action)
    assert values.dtype == jnp.float32

    # Reference matching the kernel's compute precision (bf16 MXU inputs,
    # f32 accumulation / epilogue); kernel additionally stores in bf16, so
    # allow ~1 bf16 ulp of slack.
    cd = jnp.bfloat16
    h_ref = jnp.maximum(
        jnp.dot(state.astype(cd), w1.T.astype(cd),
                preferred_element_type=jnp.float32) + b1, 0.0)
    ref_bf16 = jnp.tanh(
        jnp.dot(h_ref.astype(cd), w2.T.astype(cd),
                preferred_element_type=jnp.float32) + b2)
    assert jnp.allclose(values, ref_bf16, atol=1e-2, rtol=1e-2), \
        "mismatch vs bf16-precision reference"

    # Loose sanity check vs the exact f32 PyTorch-semantics reference
    # (difference is only bf16 matmul-input / output-store rounding).
    ref_f32 = jnp.tanh(jnp.maximum(state @ w1.T + b1, 0.0) @ w2.T + b2)
    assert jnp.allclose(values, ref_f32, atol=5e-2, rtol=5e-2), \
        "mismatch vs f32 reference"

    print("KERNEL_OK")
</pallas_src>

<mosaic_0001>
module attributes {stable_mosaic.version = 11 : i64} {
  func.func @_mlp_kernel(%arg0: i32, %arg1: memref<8x32xf32, #tpu.memory_space<vmem>>, %arg2: memref<32x128xbf16, #tpu.memory_space<vmem>>, %arg3: memref<1x128xf32, #tpu.memory_space<vmem>>, %arg4: memref<128x128xbf16, #tpu.memory_space<vmem>>, %arg5: memref<1x128xf32, #tpu.memory_space<vmem>>, %arg6: memref<8x128xbf16, #tpu.memory_space<vmem>>) attributes {dimension_semantics = [#tpu.dimension_semantics<parallel>], iteration_bounds = array<i64: 1>, scalar_prefetch = 0 : i64, scratch_operands = 0 : i64, tpu.core_type = #tpu.core_type<tc>, window_params = [{transform_indices = @transform_0, window_bounds = array<i64: 8, 32>}, {pipeline_mode = #tpu.pipeline_mode<synchronous>, transform_indices = @transform_1, window_bounds = array<i64: 32, 128>}, {pipeline_mode = #tpu.pipeline_mode<synchronous>, transform_indices = @transform_2, window_bounds = array<i64: 1, 128>}, {pipeline_mode = #tpu.pipeline_mode<synchronous>, transform_indices = @transform_3, window_bounds = array<i64: 128, 128>}, {pipeline_mode = #tpu.pipeline_mode<synchronous>, transform_indices = @transform_4, window_bounds = array<i64: 1, 128>}, {transform_indices = @transform_5, window_bounds = array<i64: 8, 128>}]} {
    %c0 = arith.constant 0 : index
    %c0_0 = arith.constant 0 : index
    %0 = vector.load %arg1[%c0, %c0_0] : memref<8x32xf32, #tpu.memory_space<vmem>>, vector<8x32xf32>
    %1 = arith.truncf %0 : vector<8x32xf32> to vector<8x32xbf16>
    %c0_1 = arith.constant 0 : index
    %c0_2 = arith.constant 0 : index
    %2 = vector.load %arg2[%c0_1, %c0_2] : memref<32x128xbf16, #tpu.memory_space<vmem>>, vector<32x128xbf16>
    %cst = arith.constant dense<0.000000e+00> : vector<8x128xf32>
    %3 = tpu.matmul %1, %2, %cst {dimension_numbers = #tpu.dot_dimension_numbers<[1], [0], [0], [1], [0, 0, 1, 1], [], []>} : vector<8x32xbf16>, vector<32x128xbf16>, vector<8x128xf32> -> vector<8x128xf32>
    %c0_3 = arith.constant 0 : index
    %c0_4 = arith.constant 0 : index
    %4 = vector.load %arg3[%c0_3, %c0_4] : memref<1x128xf32, #tpu.memory_space<vmem>>, vector<1x128xf32>
    %5 = vector.broadcast %4 : vector<1x128xf32> to vector<8x128xf32>
    %6 = arith.addf %3, %5 : vector<8x128xf32>
    %cst_5 = arith.constant 0.000000e+00 : f32
    %7 = vector.broadcast %cst_5 : f32 to vector<8x128xf32>
    %8 = arith.maximumf %6, %7 : vector<8x128xf32>
    %9 = arith.truncf %8 : vector<8x128xf32> to vector<8x128xbf16>
    %c0_6 = arith.constant 0 : index
    %c0_7 = arith.constant 0 : index
    %10 = vector.load %arg4[%c0_6, %c0_7] : memref<128x128xbf16, #tpu.memory_space<vmem>>, vector<128x128xbf16>
    %cst_8 = arith.constant dense<0.000000e+00> : vector<8x128xf32>
    %11 = tpu.matmul %9, %10, %cst_8 {dimension_numbers = #tpu.dot_dimension_numbers<[1], [0], [0], [1], [0, 0, 1, 1], [], []>} : vector<8x128xbf16>, vector<128x128xbf16>, vector<8x128xf32> -> vector<8x128xf32>
    %c0_9 = arith.constant 0 : index
    %c0_10 = arith.constant 0 : index
    %12 = vector.load %arg5[%c0_9, %c0_10] : memref<1x128xf32, #tpu.memory_space<vmem>>, vector<1x128xf32>
    %13 = vector.broadcast %12 : vector<1x128xf32> to vector<8x128xf32>
    %14 = arith.addf %11, %13 : vector<8x128xf32>
    %15 = math.tanh %14 : vector<8x128xf32>
    %16 = arith.truncf %15 : vector<8x128xf32> to vector<8x128xbf16>
    %c0_11 = arith.constant 0 : index
    %c0_12 = arith.constant 0 : index
    %17 = vector.load %arg6[%c0_11, %c0_12] : memref<8x128xbf16, #tpu.memory_space<vmem>>, vector<8x128xbf16>
    tpu.vector_store %arg6[%c0_11, %c0_12], %16 {strides = array<i32>} : memref<8x128xbf16, #tpu.memory_space<vmem>>, vector<8x128xbf16>,
    return
  }
  func.func @transform_0(%arg0: i32) -> (i32, i32) {
    %c0_i32 = arith.constant 0 : i32
    %c0_i32_0 = arith.constant 0 : i32
    return %arg0, %c0_i32 : i32, i32
  }
  func.func @transform_1(%arg0: i32) -> (i32, i32) {
    %c0_i32 = arith.constant 0 : i32
    %c0_i32_0 = arith.constant 0 : i32
    %c0_i32_1 = arith.constant 0 : i32
    return %c0_i32, %c0_i32_0 : i32, i32
  }
  func.func @transform_2(%arg0: i32) -> (i32, i32) {
    %c0_i32 = arith.constant 0 : i32
    %c0_i32_0 = arith.constant 0 : i32
    %c0_i32_1 = arith.constant 0 : i32
    return %c0_i32, %c0_i32_0 : i32, i32
  }
  func.func @transform_3(%arg0: i32) -> (i32, i32) {
    %c0_i32 = arith.constant 0 : i32
    %c0_i32_0 = arith.constant 0 : i32
    %c0_i32_1 = arith.constant 0 : i32
    return %c0_i32, %c0_i32_0 : i32, i32
  }
  func.func @transform_4(%arg0: i32) -> (i32, i32) {
    %c0_i32 = arith.constant 0 : i32
    %c0_i32_0 = arith.constant 0 : i32
    %c0_i32_1 = arith.constant 0 : i32
    return %c0_i32, %c0_i32_0 : i32, i32
  }
  func.func @transform_5(%arg0: i32) -> (i32, i32) {
    %c0_i32 = arith.constant 0 : i32
    %c0_i32_0 = arith.constant 0 : i32
    return %arg0, %c0_i32 : i32, i32
  }
}

</mosaic_0001>

<bundles_post_ra>
// kernel: tpu_custom_call.1
= control target key start
LH: loop header
LB: loop body
LE: loop exit
PB: predicated region body
PF: predicated region fallthrough
CT: control target
= control target key end

     0   :  { %10 = vsyncpa [#allocation3], 0  ;;  %s427_s0 = inlined_call_operand.hbm [shape: f32[8,32], index: 0, kind: input, shape index: {}]   ;;  %s428_s1 = inlined_call_operand.hbm [shape: bf16[32,128], index: 1, kind: input, shape index: {}]   ;;  %s429_s2 = inlined_call_operand.vmem [shape: f32[1,128], index: 2, kind: input, shape index: {}]   ;;  %s430_s3 = inlined_call_operand.hbm [shape: bf16[128,128], index: 3, kind: input, shape index: {}]   ;;  %s431_s4 = inlined_call_operand.vmem [shape: f32[1,128], index: 4, kind: input, shape index: {}]   ;;  %s432_s5 = inlined_call_operand.hbm [shape: bf16[8,128], index: 5, kind: output, shape index: {}]  }
   0x1   :  { %11 = vsyncpa [#allocation6], 0  ;;  %s28_s20 = sshll.u32 %s428_s1, 4  ;;  %s29_s20 = int_to_ptr.hbm [resolvable:$true] %s28_s20 }
   0x2   :  { %12 = vsyncpa [#allocation4], 0  ;;  %s373_s21 = smov [#allocation5]   ;;  %s18_s25 = sshll.u32 %s427_s0, 4  ;;  %s19_s25 = int_to_ptr.hbm [resolvable:$true] %s18_s25 }
   0x3   :  { %s30_s22 = sshll.u32 %s373_s21, 4  ;;  %s374_s26 = smov 64   ;;  %s31_s22 = int_to_ptr.vmem [resolvable:$true] %s30_s22 }
   0x4   :  { %s375_s27 = smov 4   ;;  %s376_s28 = smov [#allocation2]  }
   0x5   :  { %36 = dma.hbm_to_vmem [thread:$0]  %s29_s20, 256, %s31_s22, [#allocation6], %s374_s26, %s374_s26, %s375_s27  }
   0x6   :  { %s20_s29 = sshll.u32 %s376_s28, 4  ;;  %s43_s7 = sshll.u32 %s430_s3, 4  ;;  %s21_s29 = int_to_ptr.vmem [resolvable:$true] %s20_s29  ;;  %s44_s7 = int_to_ptr.hbm [resolvable:$true] %s43_s7 }
   0x7   :  { %23 = dma.hbm_to_vmem [thread:$0]  %s19_s25, 128, %s21_s29, [#allocation3]  }
   0x8   :  { %s377_s1 = smov [#allocation7]  }
   0x9   :  { %s45_s8 = sshll.u32 %s377_s1, 4  ;;  %s46_s8 = int_to_ptr.vmem [resolvable:$true] %s45_s8 }
   0xa   :  { %51 = dma.hbm_to_vmem [thread:$0]  %s44_s7, 1024, %s46_s8, [#allocation6], %s374_s26, %s374_s26, %s375_s27  }
   0xb   :  { %367 = dma.done.wait [#allocation3], 128  }
   0xc   :  { %368 = vsyncadd [#allocation3], 4294967168 }
   0xd   :  { %369 = dma.done.wait [#allocation6], 1280  }
   0xe   :  { %370 = vsyncadd [#allocation6], 4294966016  ;;  %v252_v0 = vld [vmem:[#allocation5 + $0x8] sm:$0xff]  ;;  %v251_v2 = vld [vmem:[#allocation5] sm:$0xff]  ;;  %vm89_vm0 = vcmask 261120   ;;  %s378_s11 = smov [#allocation8]  }
   0xf   :  { %v260_v1 = vld [vmem:[#allocation7 + $0x38] sm:$0xff]  ;;  %99 = vmatpush.bf16.msra.mxu0 %v252_v0  ;;  %v67_v3 = vld [vmem:[#allocation2] sm:$0xff]  ;;  %v259_v4 = vld [vmem:[#allocation7 + $0x30] sm:$0xff]  ;;  %s197_s12 = sshll.u32 %s378_s11, 4  ;;  %s199_s15 = sshll.u32 %s432_s5, 4  ;;  %s198_s12 = int_to_ptr.vmem [resolvable:$true] %s197_s12  ;;  %s200_s15 = int_to_ptr.hbm [resolvable:$true] %s199_s15 }
  0x10   :  { %176 = vmatpush.bf16.msra.mxu1 %v260_v1  ;;  %v68_v5 = vpack.c.bf16 %v67_v3, %v67_v3  ;;  %v258_v6 = vld [vmem:[#allocation7 + $0x28] sm:$0xff]  ;;  %v257_v7 = vld [vmem:[#allocation7 + $0x20] sm:$0xff]  ;;  %v256_v8 = vld [vmem:[#allocation7 + $0x18] sm:$0xff] }
  0x11   :  { %v255_v9 = vld [vmem:[#allocation7 + $0x10] sm:$0xff]  ;;  %v254_v10 = vld [vmem:[#allocation7 + $0x8] sm:$0xff]  ;;  %v253_v11 = vld [vmem:[#allocation7] sm:$0xff] }
  0x12   :  { %v267_v12 = vld [vmem:[%s429_s2] ss:$0 sm:$0xff] }
  0x13   :  { %100 = vmatpush.bf16.msra.mxu0 %v251_v2  ;;  %v268_v18 = vld [vmem:[%s431_s4] ss:$0 sm:$0xff] }
  0x14   :  { %177 = vmatpush.bf16.msra.mxu1 %v259_v4 }
  0x16   :  { %218 = vmatmul.msk.bf16.vlgmr.msra.gmra.mxu0 %vm89_vm0, %v68_v5 }
  0x18   :  { %178 = vmatpush.bf16.msra.mxu1 %v258_v6 }
  0x1c   :  { %179 = vmatpush.bf16.msra.mxu1 %v257_v7 }
  0x20   :  { %180 = vmatpush.bf16.msra.mxu1 %v256_v8 }
  0x24   :  { %181 = vmatpush.bf16.msra.mxu1 %v255_v9 }
  0x28   :  { %182 = vmatpush.bf16.msra.mxu1 %v254_v10 }
  0x2c   :  { %183 = vmatpush.bf16.msra.mxu1 %v253_v11 }
  0x93   :  { %v102_v13 = vpop.f32.mrf.mxu0 }
  0x94   :  { %v103_v14 = vadd.f32 %v267_v12, %v102_v13 }
  0x96   :  { %v106_v15 = vmax.f32 %v103_v14, 0.0 }
  0x98   :  { %v107_v16 = vpack.c.bf16 %v106_v15, %v106_v15 }
  0x9a   :  { %184 = vmatmul.bf16.vlgmr.msra.gmra.mxu1 %v107_v16 }
  0x9b   :  { %v104_v17 = vpop.f32.mrf.mxu0 }
 0x117   :  { %v185_v19 = vpop.f32.mrf.mxu1 }
 0x118   :  { %v186_v20 = vadd.f32 %v268_v18, %v185_v19 }
 0x11a   :  { %269 = vtanh.f32 %v186_v20 }
 0x11f   :  { %v187_v21 = vpop.f32.mrf.mxu1 }
 0x120   :  { %v270_v22 = vpop.eup %269 }
 0x121   :  { %v190_v23 = vpack.c.bf16 %v270_v22, %v270_v22 }
 0x123   :  { %191 = vst [vmem:[#allocation8] sm:$0xf] %v190_v23 }
 0x124   :  { %202 = dma.vmem_to_hbm [thread:$0]  %s198_s12, 64, %s200_s15, [#allocation4]  }
 0x125   :  { %371 = dma.done.wait [#allocation4], 64  }
 0x126   :  { %372 = vsyncadd [#allocation4], 4294967232 }
 0x127   :  { %207 = vsyncpa [#allocation3], 1 }
 0x128   :  { %208 = vsyncpa [#allocation6], 1 }
 0x129   :  { %209 = vsyncpa [#allocation4], 1 }

</bundles_post_ra>
